<compile_context>
chip_gen: v7x
topology: tpu7x:2x2x1
jax: 0.10.0
libtpu: 0.0.40
codegen_flags: <defaults>
</compile_context>

<pallas_src>
import functools

import jax
import jax.numpy as jnp
from jax import lax
from jax.experimental import pallas as pl
from jax.experimental.pallas import tpu as pltpu


def _round_up(x, m):
    return ((x + m - 1) // m) * m


def _param_extractor_kernel(tokens_ref, emb_ref, w1_ref, b1_ref,
                            w2_ref, b2_ref, wc_ref, bc_ref, out_ref, *, L):
    M = tokens_ref.shape[1]                  # bt * L  (lane-dense token tile)
    bt = M // L
    Vp, _ = emb_ref.shape

    tokens = tokens_ref[...].reshape(M, 1)                       # (M, 1) int32

    # --- Embedding: exact gather via one-hot @ table (one MXU matmul) ---
    vp_iota = lax.broadcasted_iota(jnp.int32, (1, Vp), 1)        # tiny iota
    one_hot = (tokens == vp_iota).astype(jnp.float32)            # (M, Vp)
    x = jnp.dot(one_hot, emb_ref[...],
                preferred_element_type=jnp.float32)              # (M, E)

    # --- Sequence-boundary masks shared by both conv layers ---
    row = lax.broadcasted_iota(jnp.int32, (M, 1), 0)
    t = row % L
    is_first = t == 0            # x[t-1] is the zero pad at t == 0
    is_last = t == (L - 1)       # x[t+1] is the zero pad at t == L-1

    def conv_relu(h, w_ref, b_ref):
        # h: (M, Cin); w_ref: (3, Cin, Cout) with taps [t-1, t, t+1].
        # Three lane-aligned MXU matmuls that accumulate, instead of a
        # lane-axis concatenate (no (M, 3*Cin) repack temporary).
        x_prev = jnp.where(is_first, 0.0, pltpu.roll(h, 1, 0))       # row i <- i-1
        x_next = jnp.where(is_last, 0.0, pltpu.roll(h, M - 1, 0))    # row i <- i+1
        y = (jnp.dot(x_prev, w_ref[0], preferred_element_type=jnp.float32)
             + jnp.dot(h,      w_ref[1], preferred_element_type=jnp.float32)
             + jnp.dot(x_next, w_ref[2], preferred_element_type=jnp.float32))
        return jnp.maximum(y + b_ref[...], 0.0)

    h1 = conv_relu(x, w1_ref, b1_ref)          # (M, 32)
    h2 = conv_relu(h1, w2_ref, b2_ref)         # (M, 16)

    # --- Global max over the sequence axis, then lane-padded classifier ---
    c2 = h2.shape[1]
    pooled = jnp.max(h2.reshape(bt, L, c2), axis=1)                  # (bt, 16)
    logits = jnp.dot(pooled, wc_ref[...], preferred_element_type=jnp.float32)
    # TODO(synk): if output HBM writeback ever dominates (v5e, huge B), pack
    # several samples per 128-lane row instead of 128-padding each sample.
    out_ref[...] = logits + bc_ref[...]                              # (bt, 128)


def parameter_extractor(tokens, kp, *, batch_tile=128):
    """tokens: (B, L) int32; kp: params from prepare_kernel_params.
    Returns (B, num_out) f32 logits.

    batch_tile guidance: v5e -> bt*L >= 128 is enough (128x128 MXU);
    v6e/v7x -> bt*L >= 512; on v7x keep Bp//bt >= 2 so both TCs get work."""
    B, L = tokens.shape
    bt = _round_up(min(batch_tile, _round_up(B, 8)), 8)   # clamp for tiny B
    Bp = _round_up(B, bt)
    if Bp != B:
        tokens = jnp.pad(tokens, ((0, Bp - B), (0, 0)))   # pad rows use id 0
    grid = Bp // bt
    tok2d = tokens.reshape(grid, bt * L)                  # lane-dense token tiles

    emb, w1s, b1 = kp["emb"], kp["w1s"], kp["b1"]
    w2s, b2, wc, bc = kp["w2s"], kp["b2"], kp["wc"], kp["bc"]
    Vp, E = emb.shape
    lanes = wc.shape[1]

    out = pl.pallas_call(
        functools.partial(_param_extractor_kernel, L=L),
        out_shape=jax.ShapeDtypeStruct((Bp, lanes), jnp.float32),
        grid=(grid,),
        in_specs=[
            pl.BlockSpec((1, bt * L), lambda i: (i, 0)),     # tokens, lane-dense
            pl.BlockSpec((Vp, E), lambda i: (0, 0)),         # weights stay resident
            pl.BlockSpec(w1s.shape, lambda i: (0, 0, 0)),
            pl.BlockSpec(b1.shape, lambda i: (0, 0)),
            pl.BlockSpec(w2s.shape, lambda i: (0, 0, 0)),
            pl.BlockSpec(b2.shape, lambda i: (0, 0)),
            pl.BlockSpec(wc.shape, lambda i: (0, 0)),
            pl.BlockSpec(bc.shape, lambda i: (0, 0)),
        ],
        out_specs=pl.BlockSpec((bt, lanes), lambda i: (i, 0)),
        compiler_params=pltpu.CompilerParams(
            dimension_semantics=("parallel",),               # megacore on v7x
            vmem_limit_bytes=32 * 1024 * 1024,               # safe on v5e/v6e/v7x
        ),
    )(tok2d, emb, w1s, b1, w2s, b2, wc, bc)
    return out[:B, :kp["num_out"]]


# ----------------------------- glue / reference -----------------------------

def init_torch_params(key, vocab_size=100, embedding_dim=64):
    """Parameters in the original PyTorch layouts."""
    ks = jax.random.split(key, 7)
    return {
        "embedding": 0.1 * jax.random.normal(ks[0], (vocab_size, embedding_dim), jnp.float32),
        "conv1_w": 0.1 * jax.random.normal(ks[1], (32, embedding_dim, 3), jnp.float32),
        "conv1_b": 0.1 * jax.random.normal(ks[2], (32,), jnp.float32),
        "conv2_w": 0.1 * jax.random.normal(ks[3], (16, 32, 3), jnp.float32),
        "conv2_b": 0.1 * jax.random.normal(ks[4], (16,), jnp.float32),
        "lin_w": 0.1 * jax.random.normal(ks[5], (5, 16), jnp.float32),
        "lin_b": 0.1 * jax.random.normal(ks[6], (5,), jnp.float32),
    }


def prepare_kernel_params(tp, lane_pad=128):
    """Re-layout torch params: stacked conv taps, 128-padded vocab,
    lane-dense (zero-padded) classifier."""
    V, E = tp["embedding"].shape
    c1o = tp["conv1_w"].shape[0]
    c2o = tp["conv2_w"].shape[0]
    n_out = tp["lin_w"].shape[0]
    vp = _round_up(V, 128)

    def stack_taps(w):  # (Cout, Cin, 3) -> (3, Cin, Cout); taps [t-1, t, t+1]
        return jnp.transpose(w, (2, 1, 0))

    emb = jnp.zeros((vp, E), jnp.float32).at[:V].set(tp["embedding"])
    wc = jnp.zeros((c2o, lane_pad), jnp.float32).at[:, :n_out].set(tp["lin_w"].T)
    bc = jnp.zeros((1, lane_pad), jnp.float32).at[:, :n_out].set(tp["lin_b"])
    return {
        "emb": emb,
        "w1s": stack_taps(tp["conv1_w"]), "b1": tp["conv1_b"].reshape(1, c1o),
        "w2s": stack_taps(tp["conv2_w"]), "b2": tp["conv2_b"].reshape(1, c2o),
        "wc": wc, "bc": bc, "num_out": n_out,
    }


def _reference(tokens, tp):
    """Plain-JAX reference in the *torch* layout (NCL conv via
    lax.conv_general_dilated) — independent check of the tap ordering."""
    h = jnp.take(tp["embedding"], tokens, axis=0)          # (B, L, E)
    x = jnp.transpose(h, (0, 2, 1))                        # (B, E, L)  (NCL)

    def conv1d(z, w, b):                                   # w: (Cout, Cin, 3)
        y = lax.conv_general_dilated(z, w, window_strides=(1,), padding=((1, 1),),
                                     dimension_numbers=("NCH", "OIH", "NCH"))
        return y + b[None, :, None]

    c1 = jnp.maximum(conv1d(x, tp["conv1_w"], tp["conv1_b"]), 0.0)
    c2 = jnp.maximum(conv1d(c1, tp["conv2_w"], tp["conv2_b"]), 0.0)
    pooled = jnp.max(c2, axis=2)                           # (B, 16)
    return pooled @ tp["lin_w"].T + tp["lin_b"]


if __name__ == "__main__":
    key = jax.random.PRNGKey(0)
    vocab_size, embedding_dim = 100, 64
    L = 8

    tp = init_torch_params(key, vocab_size, embedding_dim)
    kp = prepare_kernel_params(tp)

    # Small-shape check (B=2): single grid step, tile auto-clamped to 8 rows.
    B = 2
    tokens = jax.random.randint(jax.random.fold_in(key, 7), (B, L), 0, vocab_size,
                                dtype=jnp.int32)
    out = jax.block_until_ready(parameter_extractor(tokens, kp))
    ref = jax.block_until_ready(_reference(tokens, tp))
    assert out.shape == (B, 5), out.shape
    assert jnp.allclose(out, ref, rtol=1e-4, atol=1e-4), (out, ref)

    # Multi-step check (B=37, bt=16): exercises batch padding, grid=3 and the
    # lane-dense (1, bt*L=128) token tiles.
    B2 = 37
    tokens2 = jax.random.randint(jax.random.fold_in(key, 11), (B2, L), 0, vocab_size,
                                 dtype=jnp.int32)
    out2 = jax.block_until_ready(parameter_extractor(tokens2, kp, batch_tile=16))
    ref2 = jax.block_until_ready(_reference(tokens2, tp))
    assert out2.shape == (B2, 5), out2.shape
    assert jnp.allclose(out2, ref2, rtol=1e-4, atol=1e-4), (out2, ref2)

    print("KERNEL_OK")
</pallas_src>

<mosaic_0001>
module attributes {stable_mosaic.version = 11 : i64} {
  func.func @_param_extractor_kernel(%arg0: i32, %arg1: memref<1x64xi32, #tpu.memory_space<vmem>>, %arg2: memref<128x64xf32, #tpu.memory_space<vmem>>, %arg3: memref<3x64x32xf32, #tpu.memory_space<vmem>>, %arg4: memref<1x32xf32, #tpu.memory_space<vmem>>, %arg5: memref<3x32x16xf32, #tpu.memory_space<vmem>>, %arg6: memref<1x16xf32, #tpu.memory_space<vmem>>, %arg7: memref<16x128xf32, #tpu.memory_space<vmem>>, %arg8: memref<1x128xf32, #tpu.memory_space<vmem>>, %arg9: memref<8x128xf32, #tpu.memory_space<vmem>>) attributes {dimension_semantics = [#tpu.dimension_semantics<parallel>], iteration_bounds = array<i64: 1>, scalar_prefetch = 0 : i64, scratch_operands = 0 : i64, tpu.core_type = #tpu.core_type<tc>, window_params = [{transform_indices = @transform_0, window_bounds = array<i64: 1, 64>}, {pipeline_mode = #tpu.pipeline_mode<synchronous>, transform_indices = @transform_1, window_bounds = array<i64: 128, 64>}, {pipeline_mode = #tpu.pipeline_mode<synchronous>, transform_indices = @transform_2, window_bounds = array<i64: 3, 64, 32>}, {pipeline_mode = #tpu.pipeline_mode<synchronous>, transform_indices = @transform_3, window_bounds = array<i64: 1, 32>}, {pipeline_mode = #tpu.pipeline_mode<synchronous>, transform_indices = @transform_4, window_bounds = array<i64: 3, 32, 16>}, {pipeline_mode = #tpu.pipeline_mode<synchronous>, transform_indices = @transform_5, window_bounds = array<i64: 1, 16>}, {pipeline_mode = #tpu.pipeline_mode<synchronous>, transform_indices = @transform_6, window_bounds = array<i64: 16, 128>}, {pipeline_mode = #tpu.pipeline_mode<synchronous>, transform_indices = @transform_7, window_bounds = array<i64: 1, 128>}, {transform_indices = @transform_8, window_bounds = array<i64: 8, 128>}]} {
    %c0 = arith.constant 0 : index
    %c0_0 = arith.constant 0 : index
    %0 = vector.load %arg1[%c0, %c0_0] : memref<1x64xi32, #tpu.memory_space<vmem>>, vector<1x64xi32>
    %1 = vector.shape_cast %0 : vector<1x64xi32> to vector<64x1xi32>
    %2 = tpu.iota {dimensions = array<i32: 1>} : vector<1x128xi32>
    %3 = vector.broadcast %1 : vector<64x1xi32> to vector<64x128xi32>
    %4 = vector.broadcast %2 : vector<1x128xi32> to vector<64x128xi32>
    %5 = arith.cmpi eq, %3, %4 : vector<64x128xi32>
    %6 = arith.extui %5 : vector<64x128xi1> to vector<64x128xi32>
    %7 = arith.sitofp %6 : vector<64x128xi32> to vector<64x128xf32>
    %c0_1 = arith.constant 0 : index
    %c0_2 = arith.constant 0 : index
    %8 = vector.load %arg2[%c0_1, %c0_2] : memref<128x64xf32, #tpu.memory_space<vmem>>, vector<128x64xf32>
    %cst = arith.constant dense<0.000000e+00> : vector<64x64xf32>
    %9 = tpu.matmul %7, %8, %cst {dimension_numbers = #tpu.dot_dimension_numbers<[1], [0], [0], [1], [0, 0, 1, 1], [], []>} : vector<64x128xf32>, vector<128x64xf32>, vector<64x64xf32> -> vector<64x64xf32>
    %10 = tpu.iota {dimensions = array<i32: 0>} : vector<64x1xi32>
    %c8_i32 = arith.constant 8 : i32
    %c0_i32 = arith.constant 0 : i32
    %11 = arith.cmpi eq, %c8_i32, %c0_i32 : i32
    %c1_i32 = arith.constant 1 : i32
    %12 = arith.select %11, %c1_i32, %c8_i32 : i32
    %13 = vector.broadcast %12 : i32 to vector<64x1xi32>
    %14 = arith.remsi %10, %13 : vector<64x1xi32>
    %c0_i32_3 = arith.constant 0 : i32
    %15 = vector.broadcast %c0_i32_3 : i32 to vector<64x1xi32>
    %16 = arith.cmpi ne, %14, %15 : vector<64x1xi32>
    %c0_i32_4 = arith.constant 0 : i32
    %17 = vector.broadcast %c0_i32_4 : i32 to vector<64x1xi32>
    %18 = arith.cmpi slt, %14, %17 : vector<64x1xi32>
    %c0_i32_5 = arith.constant 0 : i32
    %19 = arith.cmpi slt, %12, %c0_i32_5 : i32
    %20 = vector.broadcast %19 : i1 to vector<64x1xi1>
    %21 = vector.broadcast %20 : vector<64x1xi1> to vector<64x1xi1>
    %22 = arith.xori %18, %21 : vector<64x1xi1>
    %23 = arith.andi %22, %16 : vector<64x1xi1>
    %24 = vector.broadcast %12 : i32 to vector<64x1xi32>
    %25 = arith.addi %14, %24 : vector<64x1xi32>
    %26 = arith.select %23, %25, %14 : vector<64x1xi1>, vector<64x1xi32>
    %c0_i32_6 = arith.constant 0 : i32
    %27 = vector.broadcast %c0_i32_6 : i32 to vector<64x1xi32>
    %28 = arith.cmpi eq, %26, %27 : vector<64x1xi32>
    %c7_i32 = arith.constant 7 : i32
    %29 = vector.broadcast %c7_i32 : i32 to vector<64x1xi32>
    %30 = arith.cmpi eq, %26, %29 : vector<64x1xi32>
    %c1_i32_7 = arith.constant 1 : i32
    %31 = tpu.dynamic_rotate %9 by %c1_i32_7 dim 0 : vector<64x64xf32>, i32 -> vector<64x64xf32>
    %cst_8 = arith.constant 0.000000e+00 : f32
    %32 = vector.shape_cast %28 : vector<64x1xi1> to vector<64x1xi1>
    %33 = vector.broadcast %32 : vector<64x1xi1> to vector<64x64xi1>
    %34 = vector.broadcast %cst_8 : f32 to vector<64x64xf32>
    %35 = arith.select %33, %34, %31 : vector<64x64xi1>, vector<64x64xf32>
    %c63_i32 = arith.constant 63 : i32
    %36 = tpu.dynamic_rotate %9 by %c63_i32 dim 0 : vector<64x64xf32>, i32 -> vector<64x64xf32>
    %cst_9 = arith.constant 0.000000e+00 : f32
    %37 = vector.shape_cast %30 : vector<64x1xi1> to vector<64x1xi1>
    %38 = vector.broadcast %37 : vector<64x1xi1> to vector<64x64xi1>
    %39 = vector.broadcast %cst_9 : f32 to vector<64x64xf32>
    %40 = arith.select %38, %39, %36 : vector<64x64xi1>, vector<64x64xf32>
    %c0_10 = arith.constant 0 : index
    %c0_11 = arith.constant 0 : index
    %c0_12 = arith.constant 0 : index
    %41 = vector.load %arg3[%c0_10, %c0_11, %c0_12] : memref<3x64x32xf32, #tpu.memory_space<vmem>>, vector<1x64x32xf32>
    %42 = vector.shape_cast %41 : vector<1x64x32xf32> to vector<64x32xf32>
    %cst_13 = arith.constant dense<0.000000e+00> : vector<64x32xf32>
    %43 = tpu.matmul %35, %42, %cst_13 {dimension_numbers = #tpu.dot_dimension_numbers<[1], [0], [0], [1], [0, 0, 1, 1], [], []>} : vector<64x64xf32>, vector<64x32xf32>, vector<64x32xf32> -> vector<64x32xf32>
    %c1 = arith.constant 1 : index
    %c0_14 = arith.constant 0 : index
    %c0_15 = arith.constant 0 : index
    %44 = vector.load %arg3[%c1, %c0_14, %c0_15] : memref<3x64x32xf32, #tpu.memory_space<vmem>>, vector<1x64x32xf32>
    %45 = vector.shape_cast %44 : vector<1x64x32xf32> to vector<64x32xf32>
    %cst_16 = arith.constant dense<0.000000e+00> : vector<64x32xf32>
    %46 = tpu.matmul %9, %45, %cst_16 {dimension_numbers = #tpu.dot_dimension_numbers<[1], [0], [0], [1], [0, 0, 1, 1], [], []>} : vector<64x64xf32>, vector<64x32xf32>, vector<64x32xf32> -> vector<64x32xf32>
    %47 = arith.addf %43, %46 : vector<64x32xf32>
    %c2 = arith.constant 2 : index
    %c0_17 = arith.constant 0 : index
    %c0_18 = arith.constant 0 : index
    %48 = vector.load %arg3[%c2, %c0_17, %c0_18] : memref<3x64x32xf32, #tpu.memory_space<vmem>>, vector<1x64x32xf32>
    %49 = vector.shape_cast %48 : vector<1x64x32xf32> to vector<64x32xf32>
    %cst_19 = arith.constant dense<0.000000e+00> : vector<64x32xf32>
    %50 = tpu.matmul %40, %49, %cst_19 {dimension_numbers = #tpu.dot_dimension_numbers<[1], [0], [0], [1], [0, 0, 1, 1], [], []>} : vector<64x64xf32>, vector<64x32xf32>, vector<64x32xf32> -> vector<64x32xf32>
    %51 = arith.addf %47, %50 : vector<64x32xf32>
    %c0_20 = arith.constant 0 : index
    %c0_21 = arith.constant 0 : index
    %52 = vector.load %arg4[%c0_20, %c0_21] : memref<1x32xf32, #tpu.memory_space<vmem>>, vector<1x32xf32>
    %53 = vector.broadcast %52 : vector<1x32xf32> to vector<64x32xf32>
    %54 = arith.addf %51, %53 : vector<64x32xf32>
    %cst_22 = arith.constant 0.000000e+00 : f32
    %55 = vector.broadcast %cst_22 : f32 to vector<64x32xf32>
    %56 = arith.maximumf %54, %55 : vector<64x32xf32>
    %c1_i32_23 = arith.constant 1 : i32
    %57 = tpu.dynamic_rotate %56 by %c1_i32_23 dim 0 : vector<64x32xf32>, i32 -> vector<64x32xf32>
    %cst_24 = arith.constant 0.000000e+00 : f32
    %58 = vector.shape_cast %28 : vector<64x1xi1> to vector<64x1xi1>
    %59 = vector.broadcast %58 : vector<64x1xi1> to vector<64x32xi1>
    %60 = vector.broadcast %cst_24 : f32 to vector<64x32xf32>
    %61 = arith.select %59, %60, %57 : vector<64x32xi1>, vector<64x32xf32>
    %c63_i32_25 = arith.constant 63 : i32
    %62 = tpu.dynamic_rotate %56 by %c63_i32_25 dim 0 : vector<64x32xf32>, i32 -> vector<64x32xf32>
    %cst_26 = arith.constant 0.000000e+00 : f32
    %63 = vector.shape_cast %30 : vector<64x1xi1> to vector<64x1xi1>
    %64 = vector.broadcast %63 : vector<64x1xi1> to vector<64x32xi1>
    %65 = vector.broadcast %cst_26 : f32 to vector<64x32xf32>
    %66 = arith.select %64, %65, %62 : vector<64x32xi1>, vector<64x32xf32>
    %c0_27 = arith.constant 0 : index
    %c0_28 = arith.constant 0 : index
    %c0_29 = arith.constant 0 : index
    %67 = vector.load %arg5[%c0_27, %c0_28, %c0_29] : memref<3x32x16xf32, #tpu.memory_space<vmem>>, vector<1x32x16xf32>
    %68 = vector.shape_cast %67 : vector<1x32x16xf32> to vector<32x16xf32>
    %cst_30 = arith.constant dense<0.000000e+00> : vector<64x16xf32>
    %69 = tpu.matmul %61, %68, %cst_30 {dimension_numbers = #tpu.dot_dimension_numbers<[1], [0], [0], [1], [0, 0, 1, 1], [], []>} : vector<64x32xf32>, vector<32x16xf32>, vector<64x16xf32> -> vector<64x16xf32>
    %c1_31 = arith.constant 1 : index
    %c0_32 = arith.constant 0 : index
    %c0_33 = arith.constant 0 : index
    %70 = vector.load %arg5[%c1_31, %c0_32, %c0_33] : memref<3x32x16xf32, #tpu.memory_space<vmem>>, vector<1x32x16xf32>
    %71 = vector.shape_cast %70 : vector<1x32x16xf32> to vector<32x16xf32>
    %cst_34 = arith.constant dense<0.000000e+00> : vector<64x16xf32>
    %72 = tpu.matmul %56, %71, %cst_34 {dimension_numbers = #tpu.dot_dimension_numbers<[1], [0], [0], [1], [0, 0, 1, 1], [], []>} : vector<64x32xf32>, vector<32x16xf32>, vector<64x16xf32> -> vector<64x16xf32>
    %73 = arith.addf %69, %72 : vector<64x16xf32>
    %c2_35 = arith.constant 2 : index
    %c0_36 = arith.constant 0 : index
    %c0_37 = arith.constant 0 : index
    %74 = vector.load %arg5[%c2_35, %c0_36, %c0_37] : memref<3x32x16xf32, #tpu.memory_space<vmem>>, vector<1x32x16xf32>
    %75 = vector.shape_cast %74 : vector<1x32x16xf32> to vector<32x16xf32>
    %cst_38 = arith.constant dense<0.000000e+00> : vector<64x16xf32>
    %76 = tpu.matmul %66, %75, %cst_38 {dimension_numbers = #tpu.dot_dimension_numbers<[1], [0], [0], [1], [0, 0, 1, 1], [], []>} : vector<64x32xf32>, vector<32x16xf32>, vector<64x16xf32> -> vector<64x16xf32>
    %77 = arith.addf %73, %76 : vector<64x16xf32>
    %c0_39 = arith.constant 0 : index
    %c0_40 = arith.constant 0 : index
    %78 = vector.load %arg6[%c0_39, %c0_40] : memref<1x16xf32, #tpu.memory_space<vmem>>, vector<1x16xf32>
    %79 = vector.broadcast %78 : vector<1x16xf32> to vector<64x16xf32>
    %80 = arith.addf %77, %79 : vector<64x16xf32>
    %cst_41 = arith.constant 0.000000e+00 : f32
    %81 = vector.broadcast %cst_41 : f32 to vector<64x16xf32>
    %82 = arith.maximumf %80, %81 : vector<64x16xf32>
    %83 = vector.shape_cast %82 : vector<64x16xf32> to vector<8x8x16xf32>
    %cst_42 = arith.constant dense<0xFF800000> : vector<8x16xf32>
    %84 = vector.multi_reduction <maximumf>, %83, %cst_42 [1] : vector<8x8x16xf32> to vector<8x16xf32>
    %c0_43 = arith.constant 0 : index
    %c0_44 = arith.constant 0 : index
    %85 = vector.load %arg7[%c0_43, %c0_44] : memref<16x128xf32, #tpu.memory_space<vmem>>, vector<16x128xf32>
    %cst_45 = arith.constant dense<0.000000e+00> : vector<8x128xf32>
    %86 = tpu.matmul %84, %85, %cst_45 {dimension_numbers = #tpu.dot_dimension_numbers<[1], [0], [0], [1], [0, 0, 1, 1], [], []>} : vector<8x16xf32>, vector<16x128xf32>, vector<8x128xf32> -> vector<8x128xf32>
    %c0_46 = arith.constant 0 : index
    %c0_47 = arith.constant 0 : index
    %87 = vector.load %arg8[%c0_46, %c0_47] : memref<1x128xf32, #tpu.memory_space<vmem>>, vector<1x128xf32>
    %88 = vector.broadcast %87 : vector<1x128xf32> to vector<8x128xf32>
    %89 = arith.addf %86, %88 : vector<8x128xf32>
    %c0_48 = arith.constant 0 : index
    %c0_49 = arith.constant 0 : index
    %90 = vector.load %arg9[%c0_48, %c0_49] : memref<8x128xf32, #tpu.memory_space<vmem>>, vector<8x128xf32>
    tpu.vector_store %arg9[%c0_48, %c0_49], %89 {strides = array<i32>} : memref<8x128xf32, #tpu.memory_space<vmem>>, vector<8x128xf32>,
    return
  }
  func.func @transform_0(%arg0: i32) -> (i32, i32) {
    %c0_i32 = arith.constant 0 : i32
    %c0_i32_0 = arith.constant 0 : i32
    return %arg0, %c0_i32 : i32, i32
  }
  func.func @transform_1(%arg0: i32) -> (i32, i32) {
    %c0_i32 = arith.constant 0 : i32
    %c0_i32_0 = arith.constant 0 : i32
    %c0_i32_1 = arith.constant 0 : i32
    return %c0_i32, %c0_i32_0 : i32, i32
  }
  func.func @transform_2(%arg0: i32) -> (i32, i32, i32) {
    %c0_i32 = arith.constant 0 : i32
    %c0_i32_0 = arith.constant 0 : i32
    %c0_i32_1 = arith.constant 0 : i32
    %c0_i32_2 = arith.constant 0 : i32
    return %c0_i32, %c0_i32_0, %c0_i32_1 : i32, i32, i32
  }
  func.func @transform_3(%arg0: i32) -> (i32, i32) {
    %c0_i32 = arith.constant 0 : i32
    %c0_i32_0 = arith.constant 0 : i32
    %c0_i32_1 = arith.constant 0 : i32
    return %c0_i32, %c0_i32_0 : i32, i32
  }
  func.func @transform_4(%arg0: i32) -> (i32, i32, i32) {
    %c0_i32 = arith.constant 0 : i32
    %c0_i32_0 = arith.constant 0 : i32
    %c0_i32_1 = arith.constant 0 : i32
    %c0_i32_2 = arith.constant 0 : i32
    return %c0_i32, %c0_i32_0, %c0_i32_1 : i32, i32, i32
  }
  func.func @transform_5(%arg0: i32) -> (i32, i32) {
    %c0_i32 = arith.constant 0 : i32
    %c0_i32_0 = arith.constant 0 : i32
    %c0_i32_1 = arith.constant 0 : i32
    return %c0_i32, %c0_i32_0 : i32, i32
  }
  func.func @transform_6(%arg0: i32) -> (i32, i32) {
    %c0_i32 = arith.constant 0 : i32
    %c0_i32_0 = arith.constant 0 : i32
    %c0_i32_1 = arith.constant 0 : i32
    return %c0_i32, %c0_i32_0 : i32, i32
  }
  func.func @transform_7(%arg0: i32) -> (i32, i32) {
    %c0_i32 = arith.constant 0 : i32
    %c0_i32_0 = arith.constant 0 : i32
    %c0_i32_1 = arith.constant 0 : i32
    return %c0_i32, %c0_i32_0 : i32, i32
  }
  func.func @transform_8(%arg0: i32) -> (i32, i32) {
    %c0_i32 = arith.constant 0 : i32
    %c0_i32_0 = arith.constant 0 : i32
    return %arg0, %c0_i32 : i32, i32
  }
}

</mosaic_0001>

<bundles_post_ra>
// kernel: tpu_custom_call.1
= control target key start
LH: loop header
LB: loop body
LE: loop exit
PB: predicated region body
PF: predicated region fallthrough
CT: control target
= control target key end

     0   :  { %s2666_s0 = inlined_call_operand.vmem [shape: s32[1,64], index: 0, kind: input, shape index: {}]   ;;  %s2667_s1 = inlined_call_operand.vmem [shape: f32[128,64], index: 1, kind: input, shape index: {}]   ;;  %s2668_s2 = inlined_call_operand.vmem [shape: f32[3,64,32], index: 2, kind: input, shape index: {}]   ;;  %s2669_s3 = inlined_call_operand.vmem [shape: f32[1,32], index: 3, kind: input, shape index: {}]   ;;  %s2670_s4 = inlined_call_operand.vmem [shape: f32[3,32,16], index: 4, kind: input, shape index: {}]   ;;  %s2671_s5 = inlined_call_operand.vmem [shape: f32[1,16], index: 5, kind: input, shape index: {}]   ;;  %s2672_s6 = inlined_call_operand.vmem [shape: f32[16,128], index: 6, kind: input, shape index: {}]   ;;  %s2673_s7 = inlined_call_operand.vmem [shape: f32[1,128], index: 7, kind: input, shape index: {}]   ;;  %s2674_s8 = inlined_call_operand.hbm [shape: f32[8,128], index: 8, kind: output, shape index: {}]  }
   0x1   :  { %v1517_v0 = vld [vmem:[%s2666_s0] ss:$0 sm:$0xff]  ;;  %v93_v2 = vld [vmem:[%s2667_s1 + $0x8] sm:$0xff]  ;;  %v94_v4 = vld [vmem:[%s2667_s1 + $0x10] sm:$0xff] }
   0x2   :  { %v92_v1 = vld [vmem:[%s2667_s1] sm:$0xff]  ;;  %36 = vbcast.lane.b32.xlu0 %v1517_v0, 256  ;;  %44 = vbcast.lane.b32.xlu1 %v1517_v0, 272  ;;  %v95_v5 = vld [vmem:[%s2667_s1 + $0x18] sm:$0xff]  ;;  %v97_v8 = vld [vmem:[%s2667_s1 + $0x28] sm:$0xff] }
   0x3   :  { %v1916_v3 = vpack.c.bf16 %v93_v2, %v92_v1  ;;  %v1920_v6 = vpack.c.bf16 %v95_v5, %v94_v4  ;;  %v96_v7 = vld [vmem:[%s2667_s1 + $0x20] sm:$0xff]  ;;  %v1535_v11 = vld [vmem:[%s2668_s2 + $0x48] sm:$0xff]  ;;  %v1536_v12 = vld [vmem:[%s2668_s2 + $0x50] sm:$0xff] }
   0x4   :  { %v1534_v9 = vld [vmem:[%s2668_s2 + $0x40] sm:$0xff]  ;;  %v1924_v10 = vpack.c.bf16 %v97_v8, %v96_v7  ;;  %v1537_v13 = vld [vmem:[%s2668_s2 + $0x58] sm:$0xff]  ;;  %v98_v14 = vld [vmem:[%s2667_s1 + $0x30] sm:$0xff] }
   0x5   :  { %1917 = vmatprep.subr.bf16.mxu0 %v1916_v3  ;;  %v99_v15 = vld [vmem:[%s2667_s1 + $0x38] sm:$0xff]  ;;  %v1948_v16 = vpack.c.bf16 %v1535_v11, %v1534_v9  ;;  %v1952_v17 = vpack.c.bf16 %v1537_v13, %v1536_v12 }
   0x6   :  { %1919 = vmatpush3.bf16.msra.mxu0 %v1916_v3  ;;  %40 = vbcast.lane.b32.xlu0 %v1517_v0, 264 }
   0x7   :  { %48 = vbcast.lane.b32.xlu1 %v1517_v0, 280  ;;  %1921 = vmatprep.subr.bf16.mxu0 %v1920_v6 }
   0xa   :  { %1923 = vmatpush3.bf16.msra.mxu0 %v1920_v6 }
   0xb   :  { %13 = vsyncpa [#allocation3], 0  ;;  %52 = vbcast.lane.b32.xlu0 %v1517_v0, 288  ;;  %56 = vbcast.lane.b32.xlu1 %v1517_v0, 296  ;;  %v1538_v18 = vld [vmem:[%s2668_s2 + $0x60] sm:$0xff]  ;;  %v1539_v19 = vld [vmem:[%s2668_s2 + $0x68] sm:$0xff]  ;;  %v1928_v20 = vpack.c.bf16 %v99_v15, %v98_v14  ;;  %v66_v37 = vlaneseq }
   0xc   :  { %1925 = vmatprep.subr.bf16.mxu0 %v1924_v10  ;;  %v100_v21 = vld [vmem:[%s2667_s1 + $0x40] sm:$0xff]  ;;  %v101_v22 = vld [vmem:[%s2667_s1 + $0x48] sm:$0xff]  ;;  %1949 = vmatprep.subr.bf16.mxu1 %v1948_v16  ;;  %v1956_v23 = vpack.c.bf16 %v1539_v19, %v1538_v18  ;;  %v1540_v25 = vld [vmem:[%s2668_s2 + $0x70] sm:$0xff]  ;;  %v2084_v41 = vmov 1.0   ;;  %vm433_vm8 = vcmask 523264   ;;  %s2088_s19 = smov [#allocation2]  }
   0xd   :  { %1951 = vmatpush3.bf16.msra.mxu1 %v1948_v16  ;;  %v1932_v24 = vpack.c.bf16 %v101_v22, %v100_v21  ;;  %v1541_v26 = vld [vmem:[%s2668_s2 + $0x78] sm:$0xff]  ;;  %v102_v27 = vld [vmem:[%s2667_s1 + $0x50] sm:$0xff]  ;;  %v104_v31 = vld [vmem:[%s2667_s1 + $0x60] sm:$0xff]  ;;  %v67_v38 = vand.u32 127, %v66_v37  ;;  %v2215_v51 = vshrl.u32 %v66_v37, 7  ;;  %s1509_s20 = sshll.u32 %s2088_s19, 4  ;;  %s1510_s20 = int_to_ptr.vmem [resolvable:$true] %s1509_s20 }
   0xe   :  { %1927 = vmatpush3.bf16.msra.mxu0 %v1924_v10  ;;  %1953 = vmatprep.subr.bf16.mxu1 %v1952_v17  ;;  %v103_v28 = vld [vmem:[%s2667_s1 + $0x58] sm:$0xff]  ;;  %v1960_v29 = vpack.c.bf16 %v1541_v26, %v1540_v25  ;;  %v105_v32 = vld [vmem:[%s2667_s1 + $0x68] sm:$0xff]  ;;  %v106_v34 = vld [vmem:[%s2667_s1 + $0x70] sm:$0xff]  ;;  %s2060_s21 = scalar_lea.vmem %s1510_s20, 128  ;;  %p2065_p1 = scmp.lt.s32.totalorder %s1510_s20, %s1510_s20 }
   0xf   :  { %60 = vbcast.lane.b32.xlu0 %v1517_v0, 304  ;;  %64 = vbcast.lane.b32.xlu1 %v1517_v0, 312  ;;  %v1936_v30 = vpack.c.bf16 %v103_v28, %v102_v27  ;;  %v1940_v33 = vpack.c.bf16 %v105_v32, %v104_v31  ;;  %v107_v35 = vld [vmem:[%s2667_s1 + $0x78] sm:$0xff]  ;;  %v416_v48 = vld [vmem:[%s2668_s2] sm:$0xff]  ;;  %v417_v49 = vld [vmem:[%s2668_s2 + $0x8] sm:$0xff]  ;;  %vm2676_vm9 = vcmp.lt.s32.totalorder %v2215_v51, 1  ;;  %p2061_p0 = scmp.ne.s32.totalorder %s1510_s20, %s2060_s21  ;;  %p2066_p2 = scmp.lt.s32.totalorder %s2060_s21, %s2060_s21 }
  0x10   :  { %1929 = vmatprep.subr.bf16.mxu0 %v1928_v20  ;;  %v1944_v36 = vpack.c.bf16 %v107_v35, %v106_v34  ;;  %v1964_v50 = vpack.c.bf16 %v417_v49, %v416_v48  ;;  %v418_v52 = vld [vmem:[%s2668_s2 + $0x10] sm:$0xff]  ;;  %v419_v53 = vld [vmem:[%s2668_s2 + $0x18] sm:$0xff]  ;;  %vm2675_vm10 = vcmp.lt.s32.totalorder %v2215_v51, 7  ;;  %v420_v61 = vld [vmem:[%s2668_s2 + $0x20] sm:$0xff]  ;;  %v2239_v63 = vadd.s32 8, %v2215_v51 }
  0x11   :  { %1955 = vmatpush3.bf16.msra.mxu1 %v1952_v17  ;;  %v1968_v58 = vpack.c.bf16 %v419_v53, %v418_v52  ;;  %v421_v62 = vld [vmem:[%s2668_s2 + $0x28] sm:$0xff]  ;;  %v422_v9 = vld [vmem:[%s2668_s2 + $0x30] sm:$0xff]  ;;  %v423_v10 = vld [vmem:[%s2668_s2 + $0x38] sm:$0xff]  ;;  %v2261_v11 = vadd.s32 16, %v2215_v51  ;;  %v2266_v13 = vadd.s32 24, %v2215_v51  ;;  %v226_v28 = vand.u32 7, %v2215_v51  ;;  %p2067_p3 = por %p2066_p2, %p2065_p1 }
  0x12   :  { %1931 = vmatpush3.bf16.msra.mxu0 %v1928_v20  ;;  %1957 = vmatprep.subr.bf16.mxu1 %v1956_v23  ;;  %v1972_v6 = vpack.c.bf16 %v421_v62, %v420_v61  ;;  %v233_v12 = vand.u32 7, %v2239_v63  ;;  %v1976_v22 = vpack.c.bf16 %v423_v10, %v422_v9  ;;  %v1558_v25 = vld [vmem:[%s2668_s2 + $0x80] sm:$0xff]  ;;  %v1559_v26 = vld [vmem:[%s2668_s2 + $0x88] sm:$0xff]  ;;  %v2300_v31 = vadd.s32 32, %v2215_v51  ;;  %v1565_v9 = vld [vmem:[%s2668_s2 + $0xb8] sm:$0xff] }
  0x13   :  { %1933 = vmatprep.subr.bf16.mxu0 %v1932_v24  ;;  %v240_v27 = vand.u32 7, %v2261_v11  ;;  %vm2316_vm12 = vcmp.eq.s32.totalorder %v226_v28, 0  ;;  %v1563_v61 = vld [vmem:[%s2668_s2 + $0xa8] sm:$0xff]  ;;  %v2707_v11 = vmov 0  ;;  %p2068_p4 = pnand %p2067_p3, %p2061_p0 }
  0x14   :  { %vm2294_vm11 = vcmp.eq.s32.totalorder %v233_v12, 0  ;;  %v254_v49 = vand.u32 7, %v2300_v31 }
  0x15   :  { %1959 = vmatpush3.bf16.msra.mxu1 %v1956_v23  ;;  %vm2323_vm13 = vcmp.eq.s32.totalorder %v240_v27, 0 }
  0x16   :  { %1935 = vmatpush3.bf16.msra.mxu0 %v1932_v24  ;;  %1961 = vmatprep.subr.bf16.mxu1 %v1960_v29  ;;  %vm2387_vm15 = vcmp.eq.s32.totalorder %v254_v49, 0 }
  0x17   :  { %1937 = vmatprep.subr.bf16.mxu0 %v1936_v30 }
  0x19   :  { %1963 = vmatpush3.bf16.msra.mxu1 %v1960_v29 }
  0x1a   :  { %1939 = vmatpush3.bf16.msra.mxu0 %v1936_v30  ;;  %1965 = vmatprep.subr.bf16.mxu1 %v1964_v50  ;;  %v247_v30 = vand.u32 7, %v2266_v13 }
  0x1b   :  { %1941 = vmatprep.subr.bf16.mxu0 %v1940_v33 }
  0x1c   :  { %vm2380_vm14 = vcmp.eq.s32.totalorder %v247_v30, 0 }
  0x1e   :  { %1943 = vmatpush3.bf16.msra.mxu0 %v1940_v33 }
  0x1f   :  { %1945 = vmatprep.subr.bf16.mxu0 %v1944_v36 }
  0x22   :  { %1947 = vmatpush3.bf16.msra.mxu0 %v1944_v36 }
  0x74   :  { %v37_v39 = vpop.permute.xlu0 %36  ;;  %v45_v40 = vpop.permute.xlu1 %44 }
  0x75   :  { %vm68_vm0 = vcmp.eq.s32.totalorder %v37_v39, %v67_v38  ;;  %vm70_vm1 = vcmp.eq.s32.totalorder %v45_v40, %v67_v38 }
  0x76   :  { %1753 = vmatprep.mubr.msk.f32.mxu0 %vm68_vm0, %v2084_v41 }
  0x78   :  { %v41_v42 = vpop.permute.xlu0 %40 }
  0x79   :  { %v49_v43 = vpop.permute.xlu1 %48  ;;  %vm69_vm2 = vcmp.eq.s32.totalorder %v41_v42, %v67_v38 }
  0x7a   :  { %1754 = vmatmul.mubr.msk.f32.vlgmr.msra.gmra.mrb[0].mxu0 %vm69_vm2, %v2084_v41  ;;  %vm71_vm3 = vcmp.eq.s32.totalorder %v49_v43, %v67_v38 }
  0x7b   :  { %1756 = vmatprep.mubr.msk.f32.mxu0 %vm70_vm1, %v2084_v41 }
  0x7d   :  { %v53_v44 = vpop.permute.xlu0 %52  ;;  %v57_v45 = vpop.permute.xlu1 %56 }
  0x7e   :  { %vm72_vm4 = vcmp.eq.s32.totalorder %v53_v44, %v67_v38  ;;  %1757 = vmatmul.mubr.msk.f32.gmra.mrb[2].mxu0 %vm71_vm3, %v2084_v41  ;;  %vm73_vm5 = vcmp.eq.s32.totalorder %v57_v45, %v67_v38  ;;  %v1560_v45 = vld [vmem:[%s2668_s2 + $0x90] sm:$0xff]  ;;  %vm2431_vm3 = vcmp.eq.s32.totalorder %v226_v28, 7  ;;  %v2703_v28 = vmov 0 }
  0x7f   :  { %1759 = vmatprep.mubr.msk.f32.mxu0 %vm72_vm4, %v2084_v41  ;;  %vm2443_vm4 = vcmp.eq.s32.totalorder %v233_v12, 7  ;;  %v2705_v12 = vmov 0 }
  0x81   :  { %v61_v46 = vpop.permute.xlu0 %60  ;;  %v65_v47 = vpop.permute.xlu1 %64 }
  0x82   :  { %vm74_vm6 = vcmp.eq.s32.totalorder %v61_v46, %v67_v38  ;;  %1760 = vmatmul.mubr.msk.f32.gmra.mrb[4].mxu0 %vm73_vm5, %v2084_v41  ;;  %vm75_vm7 = vcmp.eq.s32.totalorder %v65_v47, %v67_v38  ;;  %v1561_v46 = vld [vmem:[%s2668_s2 + $0x98] sm:$0xff]  ;;  %v2334_v47 = vadd.s32 40, %v2215_v51  ;;  %vm2450_vm5 = vcmp.eq.s32.totalorder %v240_v27, 7 }
  0x83   :  { %1762 = vmatprep.mubr.msk.f32.mxu0 %vm74_vm6, %v2084_v41  ;;  %v2704_v28 = vsel %vm2450_vm5, 4294967295, %v2703_v28  ;;  %vm2463_vm6 = vcmp.eq.s32.totalorder %v247_v30, 7  ;;  %v2711_v27 = vmov 0 }
  0x84   :  { %v2706_v12 = vsel %vm2463_vm6, 4294967295, %v2705_v12 }
  0x86   :  { %1763 = vmatmul.mubr.msk.f32.gmra.mrb[6].mxu0 %vm75_vm7, %v2084_v41  ;;  %v1980_v41 = vpack.c.bf16 %v1559_v26, %v1558_v25  ;;  %vm2468_vm7 = vcmp.eq.s32.totalorder %v254_v49, 7  ;;  %v1596_v49 = vld [vmem:[%s2670_s4 + $0x48] sm:$0xff] }
  0x87   :  { %v2708_v11 = vsel %vm2468_vm7, 4294967295, %v2707_v11 }
 0x14d   :  { %v1755_v54 = vpop.f32.mrb[0].mxu0 }
 0x14e   :  { %v335_v55 = vrot.slane %v1755_v54, 7  ;;  %v376_v56 = vrot.slane %v1755_v54, 1  ;;  %v2224_v57 = vpop.f32.mrb[1].mxu0 }
 0x14f   :  { %v334_v59 = vrot.slane %v2224_v57, 7  ;;  %v375_v60 = vrot.slane %v2224_v57, 1  ;;  %1781 = vmatprep.mubr.msk.f32.mxu1 %vm433_vm8, %v2224_v57  ;;  %v1984_v57 = vpack.c.bf16 %v1561_v46, %v1560_v45  ;;  %v911_v45 = vld [vmem:[%s2670_s4 + $0x10] sm:$0xff]  ;;  %v912_v46 = vld [vmem:[%s2670_s4 + $0x18] sm:$0xff] }
 0x150   :  { %1782 = vmatmul.mubr.msk.f32.vlgmr.msra.gmra.mrb[0].mxu1 %vm433_vm8, %v1755_v54 }
 0x151   :  { %v2245_v0 = vsel %vm2676_vm9, %v334_v59, %v335_v55  ;;  %1967 = vmatpush3.bf16.msra.mxu1 %v1964_v50  ;;  %v1758_v1 = vpop.f32.mrb[2].mxu0  ;;  %v2251_v2 = vsel %vm2675_vm10, %v375_v60, %v376_v56  ;;  %v2343_v50 = vadd.s32 48, %v2215_v51 }
 0x152   :  { %v337_v3 = vrot.slane %v1758_v1, 7  ;;  %v378_v4 = vrot.slane %v1758_v1, 1  ;;  %v184_v5 = vpop.f32.mrb[3].mxu0  ;;  %1969 = vmatprep.subr.bf16.mxu1 %v1968_v58 }
 0x153   :  { %v336_v7 = vrot.slane %v184_v5, 7  ;;  %v377_v8 = vrot.slane %v184_v5, 1  ;;  %1784 = vmatprep.mubr.msk.f32.mxu1 %vm433_vm8, %v184_v5  ;;  %v268_v5 = vand.u32 7, %v2343_v50 }
 0x154   :  { %1785 = vmatmul.mubr.msk.f32.gmra.mrb[2].mxu1 %vm433_vm8, %v1758_v1 }
 0x155   :  { %v2270_v14 = vsel %vm2675_vm10, %v376_v56, %v377_v8  ;;  %1971 = vmatpush3.bf16.msra.mxu1 %v1968_v58  ;;  %v1761_v15 = vpop.f32.mrb[4].mxu0  ;;  %v348_v16 = vsel %vm2676_vm9, %v335_v55, %v336_v7  ;;  %v2276_v17 = vsel %vm2676_vm9, %v336_v7, %v337_v3  ;;  %v2280_v18 = vsel %vm2675_vm10, %v377_v8, %v378_v4  ;;  %v1564_v8 = vld [vmem:[%s2668_s2 + $0xb0] sm:$0xff] }
 0x156   :  { %v339_v19 = vrot.slane %v1761_v15, 7  ;;  %v380_v20 = vrot.slane %v1761_v15, 1  ;;  %v194_v21 = vpop.f32.mrb[5].mxu0  ;;  %1973 = vmatprep.subr.bf16.mxu1 %v1972_v6  ;;  %v369_v62 = vsel %vm2323_vm13, 0.0, %v348_v16  ;;  %v370_v7 = vsel %vm2380_vm14, 0.0, %v2276_v17 }
 0x157   :  { %v338_v23 = vrot.slane %v194_v21, 7  ;;  %v379_v24 = vrot.slane %v194_v21, 1  ;;  %1787 = vmatprep.mubr.msk.f32.mxu1 %vm433_vm8, %v194_v21  ;;  %vm2409_vm1 = vcmp.eq.s32.totalorder %v268_v5, 0  ;;  %v1575_v21 = vld [vmem:[%s2670_s4 + $0x20] sm:$0xff]  ;;  %v410_v63 = vsel %vm2450_vm5, 0.0, %v2280_v18 }
 0x158   :  { %1788 = vmatmul.mubr.msk.f32.gmra.mrb[4].mxu1 %vm433_vm8, %v1761_v15  ;;  %v2709_v18 = vmov 0 }
 0x159   :  { %1975 = vmatpush3.bf16.msra.mxu1 %v1972_v6  ;;  %v1764_v32 = vpop.f32.mrb[6].mxu0  ;;  %v346_v33 = vsel %vm2676_vm9, %v337_v3, %v338_v23  ;;  %v345_v34 = vsel %vm2676_vm9, %v338_v23, %v339_v19  ;;  %v2308_v35 = vsel %vm2675_vm10, %v378_v4, %v379_v24  ;;  %v2312_v36 = vsel %vm2675_vm10, %v379_v24, %v380_v20 }
 0x15a   :  { %v341_v37 = vrot.slane %v1764_v32, 7  ;;  %v382_v38 = vrot.slane %v1764_v32, 1  ;;  %v204_v39 = vpop.f32.mrb[7].mxu0  ;;  %1977 = vmatprep.subr.bf16.mxu1 %v1976_v22  ;;  %v221_v3 = vadd.s32 56, %v2215_v51  ;;  %v371_v10 = vsel %vm2387_vm15, 0.0, %v346_v33 }
 0x15b   :  { %v340_v42 = vrot.slane %v204_v39, 7  ;;  %v381_v43 = vrot.slane %v204_v39, 1  ;;  %1790 = vmatprep.mubr.msk.f32.mxu1 %vm433_vm8, %v204_v39  ;;  %v412_v13 = vsel %vm2468_vm7, 0.0, %v2312_v36 }
 0x15c   :  { %1791 = vmatmul.mubr.msk.f32.gmra.mrb[6].mxu1 %vm433_vm8, %v1764_v32  ;;  %v350_v48 = vsel %vm2676_vm9, %v341_v37, %v334_v59  ;;  %v2349_v52 = vsel %vm2675_vm10, %v382_v38, %v375_v60  ;;  %v368_v59 = vsel %vm2294_vm11, 0.0, %v2245_v0  ;;  %v1562_v60 = vld [vmem:[%s2668_s2 + $0xa0] sm:$0xff]  ;;  %v261_v0 = vand.u32 7, %v2334_v47 }
 0x15d   :  { %1979 = vmatpush3.bf16.msra.mxu1 %v1976_v22  ;;  %v367_v53 = vsel %vm2316_vm12, 0.0, %v350_v48  ;;  %v344_v54 = vsel %vm2676_vm9, %v339_v19, %v340_v42  ;;  %v343_v55 = vsel %vm2676_vm9, %v340_v42, %v341_v37  ;;  %v2359_v56 = vsel %vm2675_vm10, %v380_v20, %v381_v43  ;;  %v1576_v22 = vld [vmem:[%s2670_s4 + $0x28] sm:$0xff]  ;;  %v1577_v37 = vld [vmem:[%s2670_s4 + $0x30] sm:$0xff]  ;;  %v1595_v48 = vld [vmem:[%s2670_s4 + $0x40] sm:$0xff] }
 0x15e   :  { %1809 = vmatprep.mubr.msk.f32.mxu1 %vm433_vm8, %v367_v53  ;;  %1981 = vmatprep.subr.bf16.mxu1 %v1980_v41  ;;  %v2364_v58 = vsel %vm2675_vm10, %v381_v43, %v382_v38  ;;  %v1988_v6 = vpack.c.bf16 %v1563_v61, %v1562_v60  ;;  %vm2404_vm0 = vcmp.eq.s32.totalorder %v261_v0, 0  ;;  %v275_v16 = vand.u32 7, %v221_v3  ;;  %v1578_v38 = vld [vmem:[%s2670_s4 + $0x38] sm:$0xff]  ;;  %v910_v42 = vld [vmem:[%s2670_s4 + $0x8] sm:$0xff] }
 0x15f   :  { %v1992_v19 = vpack.c.bf16 %v1565_v9, %v1564_v8  ;;  %v372_v20 = vsel %vm2404_vm0, 0.0, %v345_v34  ;;  %v373_v23 = vsel %vm2409_vm1, 0.0, %v344_v54  ;;  %v1996_v26 = vpack.c.bf16 %v1576_v22, %v1575_v21 }
 0x160   :  { %1810 = vmatmul.mubr.msk.f32.vlgmr.msra.gmra.mrb[0].mxu1 %vm433_vm8, %v368_v59  ;;  %vm2424_vm2 = vcmp.eq.s32.totalorder %v275_v16, 0  ;;  %v408_v32 = vsel %vm2431_vm3, 0.0, %v2251_v2  ;;  %v409_v2 = vsel %vm2443_vm4, 0.0, %v2270_v14  ;;  %v411_v14 = vsel %vm2463_vm6, 0.0, %v2308_v35 }
 0x161   :  { %1983 = vmatpush3.bf16.msra.mxu1 %v1980_v41  ;;  %1812 = vmatprep.mubr.msk.f32.mxu1 %vm433_vm8, %v369_v62  ;;  %v374_v31 = vsel %vm2424_vm2, 0.0, %v343_v55  ;;  %vm2479_vm10 = vcmp.eq.s32.totalorder %v261_v0, 7  ;;  %vm2484_vm9 = vcmp.eq.s32.totalorder %v268_v5, 7  ;;  %vm2495_vm7 = vcmp.eq.s32.totalorder %v275_v16, 7  ;;  %v909_v41 = vld [vmem:[%s2670_s4] sm:$0xff] }
 0x162   :  { %1985 = vmatprep.subr.bf16.mxu1 %v1984_v57  ;;  %v2710_v18 = vsel %vm2479_vm10, 4294967295, %v2709_v18  ;;  %v2712_v27 = vsel %vm2484_vm9, 4294967295, %v2711_v27  ;;  %v413_v30 = vsel %vm2479_vm10, 0.0, %v2359_v56  ;;  %v414_v34 = vsel %vm2484_vm9, 0.0, %v2364_v58 }
 0x163   :  { %v2713_v35 = vmov 0  ;;  %v415_v36 = vsel %vm2495_vm7, 0.0, %v2349_v52  ;;  %v2000_v39 = vpack.c.bf16 %v1578_v38, %v1577_v37  ;;  %v2004_v43 = vpack.c.bf16 %v910_v42, %v909_v41  ;;  %v1574_v52 = vld [vmem:[%s2669_s3] ss:$0 sm:$0xff] }
 0x164   :  { %1813 = vmatmul.mubr.msk.f32.gmra.mrb[2].mxu1 %vm433_vm8, %v370_v7  ;;  %v2714_v35 = vsel %vm2495_vm7, 4294967295, %v2713_v35  ;;  %v2008_v47 = vpack.c.bf16 %v912_v46, %v911_v45  ;;  %v2528_v50 = vpack.c.bf16 %v1596_v49, %v1595_v48  ;;  %vm2715_vm7 = vcmp.lt.s32.totalorder %v2215_v51, 1  ;;  %v1597_v48 = vld [vmem:[%s2670_s4 + $0x50] sm:$0xff]  ;;  %v1598_v49 = vld [vmem:[%s2670_s4 + $0x58] sm:$0xff] }
 0x165   :  { %1987 = vmatpush3.bf16.msra.mxu1 %v1984_v57  ;;  %1815 = vmatprep.mubr.msk.f32.mxu1 %vm433_vm8, %v371_v10  ;;  %vm2716_vm9 = vcmp.lt.s32.totalorder %v2215_v51, 7  ;;  %vm2718_vm10 = vcmp.lt.s32.totalorder %v2215_v51, 7 }
 0x166   :  { %1989 = vmatprep.subr.bf16.mxu1 %v1988_v6  ;;  %2005 = vmatprep.subr.bf16.mxu0 %v2004_v43 }
 0x167   :  { %2007 = vmatpush3.bf16.msra.mxu0 %v2004_v43 }
 0x168   :  { %1816 = vmatmul.mubr.msk.f32.gmra.mrb[4].mxu1 %vm433_vm8, %v372_v20  ;;  %2009 = vmatprep.subr.bf16.mxu0 %v2008_v47 }
 0x169   :  { %1991 = vmatpush3.bf16.msra.mxu1 %v1988_v6  ;;  %1818 = vmatprep.mubr.msk.f32.mxu1 %vm433_vm8, %v373_v23 }
 0x16a   :  { %1993 = vmatprep.subr.bf16.mxu1 %v1992_v19 }
 0x16b   :  { %2011 = vmatpush3.bf16.msra.mxu0 %v2008_v47 }
 0x16c   :  { %1819 = vmatmul.mubr.msk.f32.gmra.mrb[6].mxu1 %vm433_vm8, %v374_v31  ;;  %2013 = vmatprep.subr.bf16.mxu0 %v2528_v50 }
 0x16d   :  { %1995 = vmatpush3.bf16.msra.mxu1 %v1992_v19  ;;  %1837 = vmatprep.mubr.msk.f32.mxu1 %vm433_vm8, %v408_v32 }
 0x16e   :  { %1997 = vmatprep.subr.bf16.mxu1 %v1996_v26 }
 0x170   :  { %1838 = vmatmul.mubr.msk.f32.vlgmr.msra.gmra.mrb[0].mxu1 %vm433_vm8, %v409_v2 }
 0x171   :  { %1840 = vmatprep.mubr.msk.f32.mxu1 %vm433_vm8, %v410_v63  ;;  %1999 = vmatpush3.bf16.msra.mxu1 %v1996_v26 }
 0x172   :  { %2001 = vmatprep.subr.bf16.mxu1 %v2000_v39 }
 0x174   :  { %1841 = vmatmul.mubr.msk.f32.gmra.mrb[2].mxu1 %vm433_vm8, %v411_v14 }
 0x175   :  { %1843 = vmatprep.mubr.msk.f32.mxu1 %vm433_vm8, %v412_v13  ;;  %2003 = vmatpush3.bf16.msra.mxu1 %v2000_v39 }
 0x178   :  { %1844 = vmatmul.mubr.msk.f32.gmra.mrb[4].mxu1 %vm433_vm8, %v413_v30 }
 0x179   :  { %1846 = vmatprep.mubr.msk.f32.mxu1 %vm433_vm8, %v414_v34 }
 0x17c   :  { %1847 = vmatmul.mubr.msk.f32.gmra.mrb[6].mxu1 %vm433_vm8, %v415_v36  ;;  %vm918_vm8 = vcmask 261120  }
 0x243   :  { %v1839_v53 = vpop.f32.mrb[0].mxu1 }
 0x244   :  { %v846_v54 = vadd.f32 %v1839_v53, %v1574_v52  ;;  %v791_v55 = vpop.f32.mrb[1].mxu1 }
 0x245   :  { %v845_v56 = vadd.f32 %v1574_v52, %v791_v55 }
 0x246   :  { %v854_v57 = vmax.f32 %v846_v54, 0.0 }
 0x247   :  { %v853_v58 = vmax.f32 %v845_v56, 0.0  ;;  %v1842_v59 = vpop.f32.mrb[2].mxu1 }
 0x248   :  { %v862_v60 = vrot.slane %v854_v57, 7  ;;  %v886_v61 = vrot.slane %v854_v57, 1  ;;  %v848_v62 = vadd.f32 %v1842_v59, %v1574_v52  ;;  %v801_v0 = vpop.f32.mrb[3].mxu1 }
 0x249   :  { %v861_v3 = vrot.slane %v853_v58, 7  ;;  %v885_v5 = vrot.slane %v853_v58, 1  ;;  %v847_v6 = vadd.f32 %v1574_v52, %v801_v0  ;;  %1857 = vmatprep.mubr.msk.f32.mxu1 %vm918_vm8, %v853_v58 }
 0x24a   :  { %v856_v7 = vmax.f32 %v848_v62, 0.0  ;;  %1858 = vmatmul.mubr.msk.f32.vlgmr.msra.gmra.mrb[8].mxu1 %vm918_vm8, %v854_v57 }
 0x24b   :  { %v855_v8 = vmax.f32 %v847_v6, 0.0  ;;  %v1845_v9 = vpop.f32.mrb[4].mxu1  ;;  %v875_v10 = vsel %vm2715_vm7, %v861_v3, %v862_v60  ;;  %v2540_v16 = vsel %vm2716_vm9, %v885_v5, %v886_v61  ;;  %vm2717_vm9 = vmmov %vm2715_vm7 }
 0x24c   :  { %v864_v19 = vrot.slane %v856_v7, 7  ;;  %v850_v20 = vadd.f32 %v1845_v9, %v1574_v52  ;;  %v811_v21 = vpop.f32.mrb[5].mxu1  ;;  %v888_v31 = vrot.slane %v856_v7, 1  ;;  %v901_v4 = vsel %vm2431_vm3, 0.0, %v2540_v16 }
 0x24d   :  { %v863_v22 = vrot.slane %v855_v8, 7  ;;  %v887_v23 = vrot.slane %v855_v8, 1  ;;  %v849_v26 = vadd.f32 %v1574_v52, %v811_v21  ;;  %1860 = vmatprep.mubr.msk.f32.mxu1 %vm918_vm8, %v855_v8  ;;  %v2085_v9 = vmov 0.0|0.0  }
 0x24e   :  { %v858_v32 = vmax.f32 %v850_v20, 0.0  ;;  %1861 = vmatmul.mubr.msk.f32.gmra.mrb[10].mxu1 %vm918_vm8, %v856_v7  ;;  %2020 = vmatprep.subr.bf16.mxu1 %v2085_v9  ;;  %vm1416_vm3 = vcmask 1041409  }
 0x24f   :  { %v857_v2 = vmax.f32 %v849_v26, 0.0  ;;  %v1848_v63 = vpop.f32.mrb[6].mxu1  ;;  %v874_v14 = vsel %vm2715_vm7, %v862_v60, %v863_v22  ;;  %v873_v13 = vsel %vm2717_vm9, %v863_v22, %v864_v19  ;;  %v898_v30 = vsel %vm2718_vm10, %v886_v61, %v887_v23  ;;  %vm2719_vm7 = vmmov %vm2718_vm10 }
 0x250   :  { %v866_v34 = vrot.slane %v858_v32, 7  ;;  %v852_v36 = vadd.f32 %v1848_v63, %v1574_v52  ;;  %v821_v37 = vpop.f32.mrb[7].mxu1  ;;  %v890_v38 = vrot.slane %v858_v32, 1  ;;  %v897_v45 = vsel %vm2719_vm7, %v887_v23, %v888_v31  ;;  %vm2720_vm10 = vmmov %vm2717_vm9 }
 0x251   :  { %v865_v39 = vrot.slane %v857_v2, 7  ;;  %v889_v41 = vrot.slane %v857_v2, 1  ;;  %v851_v42 = vadd.f32 %v1574_v52, %v821_v37  ;;  %1863 = vmatprep.mubr.msk.f32.mxu1 %vm918_vm8, %v857_v2  ;;  %vm2722_vm6 = vmmov %vm2720_vm10  ;;  %v2016_v60 = vpack.c.bf16 %v1598_v49, %v1597_v48 }
 0x252   :  { %v860_v43 = vmax.f32 %v852_v36, 0.0  ;;  %1864 = vmatmul.mubr.msk.f32.gmra.mrb[12].mxu1 %vm918_vm8, %v858_v32  ;;  %vm2724_vm5 = vmmov %vm2722_vm6  ;;  %v879_v40 = vsel %vm2323_vm13, 0.0, %v874_v14  ;;  %v880_v8 = vsel %vm2380_vm14, 0.0, %v873_v13  ;;  %v902_v15 = vsel %vm2443_vm4, 0.0, %v898_v30 }
 0x253   :  { %v859_v46 = vmax.f32 %v851_v42, 0.0  ;;  %v872_v47 = vsel %vm2717_vm9, %v864_v19, %v865_v39  ;;  %v871_v52 = vsel %vm2720_vm10, %v865_v39, %v866_v34  ;;  %v896_v57 = vsel %vm2719_vm7, %v888_v31, %v889_v41  ;;  %vm2721_vm9 = vmmov %vm2719_vm7  ;;  %v1607_v31 = vld [vmem:[%s2671_s5] ss:$0 sm:$0xff] }
 0x254   :  { %v868_v53 = vrot.slane %v860_v43, 7  ;;  %v892_v54 = vrot.slane %v860_v43, 1  ;;  %v895_v58 = vsel %vm2721_vm9, %v889_v41, %v890_v38  ;;  %vm2723_vm10 = vmmov %vm2719_vm7  ;;  %v881_v29 = vsel %vm2387_vm15, 0.0, %v872_v47 }
 0x255   :  { %v867_v55 = vrot.slane %v859_v46, 7  ;;  %v891_v56 = vrot.slane %v859_v46, 1  ;;  %1866 = vmatprep.mubr.msk.f32.mxu1 %vm918_vm8, %v859_v46  ;;  %vm2725_vm7 = vmmov %vm2724_vm5  ;;  %v882_v51 = vsel %vm2404_vm0, 0.0, %v871_v52  ;;  %vm2729_vm13 = vnez %v2708_v11  ;;  %v1399_v11 = vld [vmem:[%s2672_s6] sm:$0xff] }
 0x256   :  { %1867 = vmatmul.mubr.msk.f32.gmra.mrb[14].mxu1 %vm918_vm8, %v860_v43  ;;  %v876_v59 = vsel %vm2722_vm6, %v868_v53, %v861_v3  ;;  %v900_v61 = vsel %vm2723_vm10, %v892_v54, %v885_v5  ;;  %v878_v3 = vsel %vm2294_vm11, 0.0, %v875_v10  ;;  %vm2726_vm6 = vmmov %vm2721_vm9  ;;  %vm2727_vm11 = vnez %v2704_v28 }
 0x257   :  { %v877_v62 = vsel %vm2316_vm12, 0.0, %v876_v59  ;;  %v870_v0 = vsel %vm2724_vm5, %v866_v34, %v867_v55  ;;  %v869_v6 = vsel %vm2725_vm7, %v867_v55, %v868_v53  ;;  %v894_v7 = vsel %vm2721_vm9, %v890_v38, %v891_v56 }
 0x258   :  { %1877 = vmatprep.mubr.msk.f32.mxu0 %vm918_vm8, %v877_v62  ;;  %v893_v5 = vsel %vm2726_vm6, %v891_v56, %v892_v54  ;;  %v883_v44 = vsel %vm2409_vm1, 0.0, %v870_v0  ;;  %v884_v1 = vsel %vm2424_vm2, 0.0, %v869_v6  ;;  %v903_v17 = vsel %vm2727_vm11, 0.0, %v897_v45 }
 0x259   :  { %1878 = vmatmul.mubr.msk.f32.vlgmr.msra.gmra.mrb[8].mxu0 %vm918_vm8, %v878_v3  ;;  %vm2728_vm12 = vnez %v2706_v12  ;;  %v905_v25 = vsel %vm2729_vm13, 0.0, %v895_v58  ;;  %vm2730_vm14 = vnez %v2710_v18  ;;  %vm2731_vm15 = vnez %v2712_v27  ;;  %v1400_v18 = vld [vmem:[%s2672_s6 + $0x8] sm:$0xff] }
 0x25a   :  { %2015 = vmatpush3.bf16.msra.mxu0 %v2528_v50  ;;  %1880 = vmatprep.mubr.msk.f32.mxu0 %vm918_vm8, %v879_v40  ;;  %v904_v24 = vsel %vm2728_vm12, 0.0, %v896_v57  ;;  %v906_v33 = vsel %vm2730_vm14, 0.0, %v894_v7  ;;  %v907_v28 = vsel %vm2731_vm15, 0.0, %v893_v5  ;;  %vm2732_vm0 = vnez %v2714_v35 }
 0x25b   :  { %2017 = vmatprep.subr.bf16.mxu0 %v2016_v60  ;;  %v908_v12 = vsel %vm2732_vm0, 0.0, %v900_v61  ;;  %v2021_v50 = vpack.c.bf16 %v1400_v18, %v1399_v11  ;;  %vm2086_vm1 = vmmov 0   ;;  %v2087_v27 = vmov 0.0  }
 0x25c   :  { %1913 = vmatprep.mubr.msk.f32.mxu1 %vm2086_vm1, %v2087_v27  ;;  %vm1342_vm2 = vcmask 130048   ;;  %vm1418_vm4 = vcmask 1042434   ;;  %vm1420_vm5 = vcmask 1043459   ;;  %vm1424_vm10 = vcmask 1045509  }
 0x25d   :  { %1881 = vmatmul.mubr.msk.f32.gmra.mrb[10].mxu0 %vm918_vm8, %v880_v8  ;;  %2022 = vmatpush3.bf16.msra.mxu1 %v2021_v50  ;;  %vm1426_vm7 = vcmask 1046534   ;;  %vm1428_vm9 = vcmask 1047559  }
 0x25e   :  { %1883 = vmatprep.mubr.msk.f32.mxu0 %vm918_vm8, %v881_v29  ;;  %2019 = vmatpush3.bf16.msra.mxu0 %v2016_v60 }
 0x261   :  { %1884 = vmatmul.mubr.msk.f32.gmra.mrb[12].mxu0 %vm918_vm8, %v882_v51 }
 0x262   :  { %1886 = vmatprep.mubr.msk.f32.mxu0 %vm918_vm8, %v883_v44 }
 0x265   :  { %1887 = vmatmul.mubr.msk.f32.gmra.mrb[14].mxu0 %vm918_vm8, %v884_v1 }
 0x266   :  { %1897 = vmatprep.mubr.msk.f32.mxu0 %vm918_vm8, %v901_v4 }
 0x269   :  { %1898 = vmatmul.mubr.msk.f32.vlgmr.msra.gmra.mrb[8].mxu0 %vm918_vm8, %v902_v15 }
 0x26a   :  { %1900 = vmatprep.mubr.msk.f32.mxu0 %vm918_vm8, %v903_v17 }
 0x26d   :  { %1901 = vmatmul.mubr.msk.f32.gmra.mrb[10].mxu0 %vm918_vm8, %v904_v24 }
 0x26e   :  { %1903 = vmatprep.mubr.msk.f32.mxu0 %vm918_vm8, %v905_v25 }
 0x271   :  { %1904 = vmatmul.mubr.msk.f32.gmra.mrb[12].mxu0 %vm918_vm8, %v906_v33 }
 0x272   :  { %1906 = vmatprep.mubr.msk.f32.mxu0 %vm918_vm8, %v907_v28 }
 0x275   :  { %1907 = vmatmul.mubr.msk.f32.gmra.mrb[14].mxu0 %vm918_vm8, %v908_v12  ;;  %vm1422_vm8 = vcmask 1044484  }
 0x31d   :  { %v1859_v10 = vpop.f32.mrb[8].mxu1 }
 0x31e   :  { %v1009_v35 = vpop.f32.mrb[9].mxu1 }
 0x321   :  { %v1862_v16 = vpop.f32.mrb[10].mxu1 }
 0x322   :  { %v1019_v19 = vpop.f32.mrb[11].mxu1 }
 0x325   :  { %v1865_v20 = vpop.f32.mrb[12].mxu1 }
 0x326   :  { %v1029_v21 = vpop.f32.mrb[13].mxu1 }
 0x329   :  { %v1868_v22 = vpop.f32.mrb[14].mxu1 }
 0x32a   :  { %v1039_v23 = vpop.f32.mrb[15].mxu1 }
 0x33c   :  { %v1899_v26 = vpop.f32.mrb[8].mxu0 }
 0x33d   :  { %v2023_v32 = vadd.f32 %v1899_v26, %v1859_v10  ;;  %v1272_v2 = vpop.f32.mrb[9].mxu0 }
 0x33e   :  { %v2024_v63 = vadd.f32 %v1272_v2, %v1009_v35 }
 0x33f   :  { %v1327_v14 = vadd.f32 %v2023_v32, %v1607_v31 }
 0x340   :  { %v1326_v13 = vadd.f32 %v2024_v63, %v1607_v31  ;;  %v1902_v30 = vpop.f32.mrb[10].mxu0 }
 0x341   :  { %v1335_v34 = vmax.f32 %v1327_v14, 0.0  ;;  %v2025_v36 = vadd.f32 %v1902_v30, %v1862_v16  ;;  %v1282_v37 = vpop.f32.mrb[11].mxu0 }
 0x342   :  { %v1334_v38 = vmax.f32 %v1326_v13, 0.0  ;;  %v2026_v39 = vadd.f32 %v1282_v37, %v1019_v19 }
 0x343   :  { %v1350_v41 = vsel %vm1342_vm2, %v1335_v34, -inf  ;;  %v1329_v42 = vadd.f32 %v2025_v36, %v1607_v31 }
 0x344   :  { %v1351_v43 = vrot.slane %v1350_v41, 4  ;;  %v1343_v45 = vsel %vm1342_vm2, %v1334_v38, -inf  ;;  %v1328_v46 = vadd.f32 %v2026_v39, %v1607_v31  ;;  %v1905_v47 = vpop.f32.mrb[12].mxu0 }
 0x345   :  { %v1344_v48 = vrot.slane %v1343_v45, 4  ;;  %v1337_v49 = vmax.f32 %v1329_v42, 0.0  ;;  %v2027_v52 = vadd.f32 %v1905_v47, %v1865_v20  ;;  %v1292_v53 = vpop.f32.mrb[13].mxu0 }
 0x346   :  { %v1352_v54 = vmax.f32 %v1350_v41, %v1351_v43  ;;  %v1336_v55 = vmax.f32 %v1328_v46, 0.0  ;;  %v2028_v56 = vadd.f32 %v1292_v53, %v1029_v21 }
 0x347   :  { %v1345_v57 = vmax.f32 %v1343_v45, %v1344_v48  ;;  %v1364_v58 = vsel %vm1342_vm2, %v1337_v49, -inf  ;;  %v1331_v59 = vadd.f32 %v2027_v52, %v1607_v31 }
 0x348   :  { %v1353_v60 = vrot.slane %v1352_v54, 2  ;;  %v1365_v61 = vrot.slane %v1364_v58, 4  ;;  %v1357_v62 = vsel %vm1342_vm2, %v1336_v55, -inf  ;;  %v1330_v0 = vadd.f32 %v2028_v56, %v1607_v31  ;;  %v1908_v6 = vpop.f32.mrb[14].mxu0 }
 0x349   :  { %v1346_v7 = vrot.slane %v1345_v57, 2  ;;  %v1358_v3 = vrot.slane %v1357_v62, 4  ;;  %v1339_v5 = vmax.f32 %v1331_v59, 0.0  ;;  %v2029_v40 = vadd.f32 %v1908_v6, %v1868_v22  ;;  %v1302_v8 = vpop.f32.mrb[15].mxu0 }
 0x34a   :  { %v1354_v29 = vmax.f32 %v1352_v54, %v1353_v60  ;;  %v1366_v51 = vmax.f32 %v1364_v58, %v1365_v61  ;;  %v1338_v44 = vmax.f32 %v1330_v0, 0.0  ;;  %v2030_v1 = vadd.f32 %v1302_v8, %v1039_v23  ;;  %v1608_v0 = vld [vmem:[%s2673_s7] ss:$0 sm:$0xff] }
 0x34b   :  { %v1347_v4 = vmax.f32 %v1345_v57, %v1346_v7  ;;  %v1359_v15 = vmax.f32 %v1357_v62, %v1358_v3  ;;  %v1378_v17 = vsel %vm1342_vm2, %v1339_v5, -inf  ;;  %v1333_v24 = vadd.f32 %v2029_v40, %v1607_v31 }
 0x34c   :  { %v1355_v25 = vrot.slane %v1354_v29, 1  ;;  %v1367_v33 = vrot.slane %v1366_v51, 2  ;;  %v1379_v28 = vrot.slane %v1378_v17, 4  ;;  %v1371_v12 = vsel %vm1342_vm2, %v1338_v44, -inf }
 0x34d   :  { %v1348_v11 = vrot.slane %v1347_v4, 1  ;;  %v1360_v18 = vrot.slane %v1359_v15, 2  ;;  %v1372_v50 = vrot.slane %v1371_v12, 4  ;;  %v1341_v9 = vmax.f32 %v1333_v24, 0.0 }
 0x34e   :  { %v1356_v27 = vmax.f32 %v1354_v29, %v1355_v25  ;;  %v1368_v10 = vmax.f32 %v1366_v51, %v1367_v33  ;;  %v1380_v35 = vmax.f32 %v1378_v17, %v1379_v28  ;;  %v1332_v16 = vadd.f32 %v2030_v1, %v1607_v31 }
 0x34f   :  { %v1349_v19 = vmax.f32 %v1347_v4, %v1348_v11  ;;  %v1361_v20 = vmax.f32 %v1359_v15, %v1360_v18  ;;  %v1373_v21 = vmax.f32 %v1371_v12, %v1372_v50  ;;  %v1392_v22 = vsel %vm1342_vm2, %v1341_v9, -inf }
 0x350   :  { %v1369_v23 = vrot.slane %v1368_v10, 1  ;;  %v1381_v26 = vrot.slane %v1380_v35, 2  ;;  %v1393_v32 = vrot.slane %v1392_v22, 4  ;;  %v1340_v2 = vmax.f32 %v1332_v16, 0.0 }
 0x351   :  { %v1417_v63 = vsel %vm1416_vm3, %v1356_v27, %v1349_v19  ;;  %v1362_v14 = vrot.slane %v1361_v20, 1  ;;  %v1374_v13 = vrot.slane %v1373_v21, 2 }
 0x352   :  { %v1382_v30 = vmax.f32 %v1380_v35, %v1381_v26  ;;  %v1394_v34 = vmax.f32 %v1392_v22, %v1393_v32  ;;  %v1385_v36 = vsel %vm1342_vm2, %v1340_v2, -inf  ;;  %v1370_v39 = vmax.f32 %v1368_v10, %v1369_v23 }
 0x353   :  { %v1363_v37 = vmax.f32 %v1361_v20, %v1362_v14  ;;  %v1375_v31 = vmax.f32 %v1373_v21, %v1374_v13  ;;  %v1386_v38 = vrot.slane %v1385_v36, 4 }
 0x354   :  { %v1383_v41 = vrot.slane %v1382_v30, 1  ;;  %v1395_v42 = vrot.slane %v1394_v34, 2 }
 0x355   :  { %v1419_v43 = vsel %vm1418_vm4, %v1363_v37, %v1417_v63  ;;  %v1376_v45 = vrot.slane %v1375_v31, 1  ;;  %v1387_v46 = vmax.f32 %v1385_v36, %v1386_v38 }
 0x356   :  { %v1421_v47 = vsel %vm1420_vm5, %v1370_v39, %v1419_v43  ;;  %v1396_v48 = vmax.f32 %v1394_v34, %v1395_v42  ;;  %v1384_v53 = vmax.f32 %v1382_v30, %v1383_v41 }
 0x357   :  { %v1377_v49 = vmax.f32 %v1375_v31, %v1376_v45  ;;  %v1388_v52 = vrot.slane %v1387_v46, 2 }
 0x358   :  { %v1397_v56 = vrot.slane %v1396_v48, 1 }
 0x359   :  { %v1423_v54 = vsel %vm1422_vm8, %v1377_v49, %v1421_v47  ;;  %v1389_v55 = vmax.f32 %v1387_v46, %v1388_v52 }
 0x35a   :  { %v1425_v57 = vsel %vm1424_vm10, %v1384_v53, %v1423_v54  ;;  %v1398_v60 = vmax.f32 %v1396_v48, %v1397_v56 }
 0x35b   :  { %v1390_v58 = vrot.slane %v1389_v55, 1 }
 0x35d   :  { %v1391_v59 = vmax.f32 %v1389_v55, %v1390_v58 }
 0x35f   :  { %v1427_v61 = vsel %vm1426_vm7, %v1391_v59, %v1425_v57 }
 0x360   :  { %v1429_v62 = vsel %vm1428_vm9, %v1398_v60, %v1427_v61 }
 0x361   :  { %1914 = vmatmul.mubr.msk.f32.vlgmr.msra.gmra.mrb[16].mxu1 %vm1342_vm2, %v1429_v62 }
 0x434   :  { %v1498_v6 = vpop.f32.mrb[16].mxu1 }
 0x435   :  { %v1499_v7 = vadd.f32 %v1608_v0, %v1498_v6  ;;  %v1915_v3 = vpop.f32.mrb[17].mxu1 }
 0x437   :  { %1502 = vst [vmem:[#allocation2] sm:$0xff] %v1499_v7 }
 0x438   :  { %2071 = shalt.err (!%p2068_p4)
}
 0x439   :  { %s2072_s24 = scalar_lea.hbm %s2674_s8, 128 }
 0x43a   :  { %p2073_p5 = scmp.ne.s32.totalorder %s2674_s8, %s2072_s24  ;;  %p2076_p6 = scmp.lt.u32.totalorder %s2072_s24, %s2674_s8 }
 0x43c   :  { %p2078_p7 = pnand %p2076_p6, %p2073_p5 }
 0x43e   :  { %2081 = shalt.err (!%p2078_p7)
}
 0x43f   :  { %1512 = dma.vmem_to_hbm [thread:$0]  %s1510_s20, 128, %s2674_s8, [#allocation3]  }
 0x440   :  { %2082 = dma.done.wait [#allocation3], 128  }
 0x441   :  { %2083 = vsyncadd [#allocation3], 4294967168 }
 0x442   :  { %1516 = vsyncpa [#allocation3], 1 }

</bundles_post_ra>
